<compile_context>
chip_gen: v6e
topology: v6e:2x2x1
jax: 0.10.0
libtpu: 0.0.40
codegen_flags: <defaults>
</compile_context>

<pallas_src>
import jax
import jax.numpy as jnp
from jax.experimental import pallas as pl
from jax.experimental.pallas import tpu as pltpu

HID = 128          # self.hid_dim
TEXT_H = 32        # stand-in for roberta-large hidden_size (1024)
VIS_H = 32         # stand-in for DeiT hidden_size (768)
N_CAT = 4          # W_category out
N_SYS = 2          # W_system out
SYSTEM_TOKEN_ID = 7
EPS = 1e-6         # CosineSimilarity eps
MAX_SYS = 4        # max [SYSTEM] tokens kept per batch element (padded)
LANES = 128        # lane-dense output slab width
CAT_LANE = 2       # category logits occupy lanes [CAT_LANE, CAT_LANE + N_CAT)


def _vmem_spec():
    return pl.BlockSpec(memory_space=pltpu.MemorySpace.VMEM)


# ----------------------------------------------------------------------------
# Single fused kernel: projections + cosine scores + category + system logits.
# ----------------------------------------------------------------------------
def _fused_kernel(tm_cls_ref,                 # (2B, TEXT_H)      [text_cls; meta_cls]
                  ov_cls_ref,                 # (B, 2*VIS_H)      [obj_cls | bg_cls]
                  sys_rows_ref,               # (B*MAX_SYS, TEXT_H) gathered [SYSTEM] rows
                  wt_ref, bt_ref,             # text2hid
                  wvbg_ref, bvbg_ref,         # stacked visual2hid / bg2hid
                  wcat_ref, bcat_ref,         # W_category, zero-padded to 128 lanes
                  ws_ref, bs_ref,             # W_system,   zero-padded to 128 lanes
                  out_ref):                   # (ROWS, 128) f32 lane-dense slab
    f32 = jnp.float32
    B = ov_cls_ref.shape[0]
    n_sys = sys_rows_ref.shape[0]
    rows = out_ref.shape[0]
    used = B + n_sys

    # ---- fused projections (2 MXU dots instead of 4) ----
    tm_h = jnp.dot(tm_cls_ref[...], wt_ref[...],
                   preferred_element_type=f32) + bt_ref[...]
    t_h = tm_h[:B]
    m_h = tm_h[B:]
    # v_h = o_h + bg_h via a single dot over the concatenated visual features.
    v_h = jnp.dot(ov_cls_ref[...], wvbg_ref[...],
                  preferred_element_type=f32) + bvbg_ref[...]

    # ---- cosine scores; ||v_h|| computed once and shared ----
    v_nrm = jnp.maximum(jnp.sqrt(jnp.sum(v_h * v_h, axis=1, keepdims=True)), EPS)
    t_nrm = jnp.maximum(jnp.sqrt(jnp.sum(t_h * t_h, axis=1, keepdims=True)), EPS)
    m_nrm = jnp.maximum(jnp.sqrt(jnp.sum(m_h * m_h, axis=1, keepdims=True)), EPS)
    tv_dot = jnp.sum(t_h * v_h, axis=1, keepdims=True)
    mv_dot = jnp.sum(m_h * v_h, axis=1, keepdims=True)

    # t2v: cheap EUP approx reciprocal is fine (result only scaled by 0.5).
    t2v = (tv_dot * pl.reciprocal(t_nrm * v_nrm, approx=True) + 1.0) * 0.5
    # m2v: exact divide — the x100 before sigmoid would amplify approx error.
    m2v = jax.nn.sigmoid((mv_dot / (m_nrm * v_nrm)) * 100.0)

    # ---- heads: lane-dense dots against zero-padded weights ----
    cat_p = jnp.dot(t_h, wcat_ref[...],
                    preferred_element_type=f32) + bcat_ref[...]       # (B, 128)
    sys_p = jnp.dot(sys_rows_ref[...], ws_ref[...],
                    preferred_element_type=f32) + bs_ref[...]         # (n_sys, 128)

    # ---- slab stores: full-row lane-dense stores + two tiny score columns ----
    out_ref[0:B, :] = cat_p                      # lanes 0,1 are zero (padded W)
    out_ref[B:used, :] = sys_p
    out_ref[0:B, 0:2] = jnp.concatenate([t2v, m2v], axis=1)
    if rows > used:                              # static: zero the padding rows
        out_ref[used:rows, :] = jnp.zeros((rows - used, LANES), f32)


# ----------------------------------------------------------------------------
# Full forward: mirrors BaseModel.forward for the fixed config above.
# Fully on-device / jit-able (no device_get, no Python per-batch loop).
# ----------------------------------------------------------------------------
def base_model_forward(text_hidden, meta_hidden, obj_hidden, bg_hidden,
                       text_tokens, params):
    (wt, bt, wv, bv, wbg, bbg, wcat, bcat, ws, bs) = params
    B, S, TH = text_hidden.shape
    f32 = jnp.float32

    # CLS (position-0) representations, exactly like `[:, 0, :]` in the module.
    text_cls = text_hidden[:, 0, :]
    meta_cls = meta_hidden[:, 0, :]
    obj_cls = obj_hidden[:, 0, :]
    bg_cls = bg_hidden[:, 0, :]

    # Fused matmul operands.
    tm_cls = jnp.concatenate([text_cls, meta_cls], axis=0)          # (2B, TH)
    ov_cls = jnp.concatenate([obj_cls, bg_cls], axis=1)             # (B, 2*VH)
    wvbg = jnp.concatenate([wv, wbg], axis=0)                       # (2*VH, HID)
    bvbg = bv + bbg

    # Device-side [SYSTEM]-token position selection, padded to MAX_SYS, and the
    # row gather done HERE so only B*MAX_SYS rows ever reach the kernel's VMEM.
    sys_tok_mask = text_tokens == SYSTEM_TOKEN_ID                   # (B, S)
    pos_idx = jnp.arange(S, dtype=jnp.int32)
    cand = jnp.where(sys_tok_mask, pos_idx[None, :], S)
    pos_sorted = jnp.sort(cand, axis=1)[:, :MAX_SYS]                # valid first
    sys_mask = pos_sorted < S                                       # (B, MAX_SYS)
    pos = jnp.where(sys_mask, pos_sorted, 0).astype(jnp.int32)
    row_idx = (jnp.arange(B, dtype=jnp.int32)[:, None] * S + pos).reshape(-1)
    sys_rows = jnp.take(text_hidden.reshape(B * S, TH), row_idx, axis=0)

    # Zero-pad the small heads to 128 output lanes → lane-dense MXU results.
    wcat_p = jnp.zeros((HID, LANES), f32).at[:, CAT_LANE:CAT_LANE + N_CAT].set(wcat)
    bcat_p = jnp.zeros((1, LANES), f32).at[:, CAT_LANE:CAT_LANE + N_CAT].set(bcat)
    ws_p = jnp.zeros((TH, LANES), f32).at[:, :N_SYS].set(ws)
    bs_p = jnp.zeros((1, LANES), f32).at[:, :N_SYS].set(bs)

    n_sys_rows = B * MAX_SYS
    used = B + n_sys_rows
    rows = ((used + 7) // 8) * 8

    flops = 2 * (2 * B * TH * HID            # text/meta projection
                 + B * (2 * VIS_H) * HID     # visual + background projection
                 + B * HID * LANES           # category head (lane-padded)
                 + n_sys_rows * TH * LANES)  # system head (lane-padded)
    bytes_accessed = 4 * (tm_cls.size + ov_cls.size + sys_rows.size + wt.size
                          + bt.size + wvbg.size + bvbg.size + wcat_p.size
                          + bcat_p.size + ws_p.size + bs_p.size + rows * LANES)

    slab = pl.pallas_call(
        _fused_kernel,
        out_shape=jax.ShapeDtypeStruct((rows, LANES), jnp.float32),
        in_specs=[_vmem_spec()] * 11,
        out_specs=_vmem_spec(),
        compiler_params=pltpu.CompilerParams(
            # safe on v5e/v6e/v7x; re-budget tiles if a real-size grid is added
            vmem_limit_bytes=32 * 1024 * 1024),
        cost_estimate=pl.CostEstimate(
            flops=flops, transcendentals=5 * B, bytes_accessed=bytes_accessed),
    )(tm_cls, ov_cls, sys_rows, wt, bt, wvbg, bvbg, wcat_p, bcat_p, ws_p, bs_p)

    t2v_score = slab[:B, 0]
    m2v_score = slab[:B, 1]
    utt_category_logits = slab[:B, CAT_LANE:CAT_LANE + N_CAT]
    system_logits = slab[B:B + n_sys_rows, :N_SYS].reshape(B, MAX_SYS, N_SYS)
    system_logits = jnp.where(sys_mask[..., None], system_logits, 0.0)

    # NOTE: original module returns a ragged Python list; here we return a
    # padded tensor + mask to stay on-device / jit-able (see helper below).
    return t2v_score, m2v_score, system_logits, sys_mask, utt_category_logits


def system_logits_to_list(system_logits, sys_mask):
    """Host-side convenience: rebuild the original ragged-list API."""
    logits = jax.device_get(system_logits)
    mask = jax.device_get(sys_mask)
    out = []
    for b in range(mask.shape[0]):
        n = int(mask[b].sum())
        out.append(logits[b, :n] if n > 0 else [])
    return out


# ----------------------------------------------------------------------------
if __name__ == "__main__":
    key = jax.random.PRNGKey(0)
    ks = jax.random.split(key, 16)

    B, S_TXT, S_IMG = 2, 8, 4

    # synthetic backbone hidden states (stand-ins for RoBERTa / DeiT outputs)
    text_hidden = jax.random.normal(ks[0], (B, S_TXT, TEXT_H), jnp.float32)
    meta_hidden = jax.random.normal(ks[1], (B, S_TXT, TEXT_H), jnp.float32)
    obj_hidden = jax.random.normal(ks[2], (B, S_IMG, VIS_H), jnp.float32)
    bg_hidden = jax.random.normal(ks[3], (B, S_IMG, VIS_H), jnp.float32)

    # synthetic token ids; plant a couple of [SYSTEM] tokens
    text_tokens = jax.random.randint(ks[4], (B, S_TXT), 0, 6).astype(jnp.int32)
    text_tokens = text_tokens.at[0, 2].set(SYSTEM_TOKEN_ID)
    text_tokens = text_tokens.at[0, 5].set(SYSTEM_TOKEN_ID)
    text_tokens = text_tokens.at[1, 3].set(SYSTEM_TOKEN_ID)

    # deterministic parameters (shapes from __init__)
    def lin(k, fin, fout):
        kw, kb = jax.random.split(k)
        scale = 1.0 / jnp.sqrt(fin)
        w = jax.random.uniform(kw, (fin, fout), jnp.float32, -scale, scale)
        b = jax.random.uniform(kb, (1, fout), jnp.float32, -scale, scale)
        return w, b

    wt, bt = lin(ks[5], TEXT_H, HID)      # text2hid
    wv, bv = lin(ks[6], VIS_H, HID)       # visual2hid
    wbg, bbg = lin(ks[7], VIS_H, HID)     # bg2hid
    wcat, bcat = lin(ks[8], HID, N_CAT)   # W_category
    ws, bs = lin(ks[9], TEXT_H, N_SYS)    # W_system

    params = (wt, bt, wv, bv, wbg, bbg, wcat, bcat, ws, bs)

    fwd = jax.jit(base_model_forward)
    t2v, m2v, sys_logits, sys_mask, cat_logits = fwd(
        text_hidden, meta_hidden, obj_hidden, bg_hidden, text_tokens, params)
    jax.block_until_ready((t2v, m2v, sys_logits, sys_mask, cat_logits))

    assert t2v.shape == (B,)
    assert m2v.shape == (B,)
    assert cat_logits.shape == (B, N_CAT)
    assert sys_logits.shape == (B, MAX_SYS, N_SYS)
    assert sys_mask.shape == (B, MAX_SYS)

    # parity with the original ragged-list return (host-side, outside hot path)
    sys_list = system_logits_to_list(sys_logits, sys_mask)
    assert len(sys_list) == B
    assert sys_list[0].shape == (2, N_SYS)   # two [SYSTEM] tokens in batch 0
    assert sys_list[1].shape == (1, N_SYS)   # one [SYSTEM] token in batch 1

    print("KERNEL_OK")
</pallas_src>

<mosaic_0001>
module attributes {stable_mosaic.version = 11 : i64} {
  func.func @_fused_kernel(%arg0: memref<4x32xf32, #tpu.memory_space<vmem>>, %arg1: memref<2x64xf32, #tpu.memory_space<vmem>>, %arg2: memref<8x32xf32, #tpu.memory_space<vmem>>, %arg3: memref<32x128xf32, #tpu.memory_space<vmem>>, %arg4: memref<1x128xf32, #tpu.memory_space<vmem>>, %arg5: memref<64x128xf32, #tpu.memory_space<vmem>>, %arg6: memref<1x128xf32, #tpu.memory_space<vmem>>, %arg7: memref<128x128xf32, #tpu.memory_space<vmem>>, %arg8: memref<1x128xf32, #tpu.memory_space<vmem>>, %arg9: memref<32x128xf32, #tpu.memory_space<vmem>>, %arg10: memref<1x128xf32, #tpu.memory_space<vmem>>, %arg11: memref<16x128xf32, #tpu.memory_space<vmem>>) attributes {dimension_semantics = [], scalar_prefetch = 0 : i64, scratch_operands = 0 : i64, tpu.core_type = #tpu.core_type<tc>} {
    %c0 = arith.constant 0 : index
    %c0_0 = arith.constant 0 : index
    %0 = vector.load %arg0[%c0, %c0_0] : memref<4x32xf32, #tpu.memory_space<vmem>>, vector<4x32xf32>
    %c0_1 = arith.constant 0 : index
    %c0_2 = arith.constant 0 : index
    %1 = vector.load %arg3[%c0_1, %c0_2] : memref<32x128xf32, #tpu.memory_space<vmem>>, vector<32x128xf32>
    %cst = arith.constant dense<0.000000e+00> : vector<4x128xf32>
    %2 = tpu.matmul %0, %1, %cst {dimension_numbers = #tpu.dot_dimension_numbers<[1], [0], [0], [1], [0, 0, 1, 1], [], []>} : vector<4x32xf32>, vector<32x128xf32>, vector<4x128xf32> -> vector<4x128xf32>
    %c0_3 = arith.constant 0 : index
    %c0_4 = arith.constant 0 : index
    %3 = vector.load %arg4[%c0_3, %c0_4] : memref<1x128xf32, #tpu.memory_space<vmem>>, vector<1x128xf32>
    %4 = vector.broadcast %3 : vector<1x128xf32> to vector<4x128xf32>
    %5 = arith.addf %2, %4 : vector<4x128xf32>
    %6 = vector.extract_strided_slice %5 {offsets = [0, 0], sizes = [2, 128], strides = [1, 1]} : vector<4x128xf32> to vector<2x128xf32>
    %7 = vector.extract_strided_slice %5 {offsets = [2, 0], sizes = [2, 128], strides = [1, 1]} : vector<4x128xf32> to vector<2x128xf32>
    %c0_5 = arith.constant 0 : index
    %c0_6 = arith.constant 0 : index
    %8 = vector.load %arg1[%c0_5, %c0_6] : memref<2x64xf32, #tpu.memory_space<vmem>>, vector<2x64xf32>
    %c0_7 = arith.constant 0 : index
    %c0_8 = arith.constant 0 : index
    %9 = vector.load %arg5[%c0_7, %c0_8] : memref<64x128xf32, #tpu.memory_space<vmem>>, vector<64x128xf32>
    %cst_9 = arith.constant dense<0.000000e+00> : vector<2x128xf32>
    %10 = tpu.matmul %8, %9, %cst_9 {dimension_numbers = #tpu.dot_dimension_numbers<[1], [0], [0], [1], [0, 0, 1, 1], [], []>} : vector<2x64xf32>, vector<64x128xf32>, vector<2x128xf32> -> vector<2x128xf32>
    %c0_10 = arith.constant 0 : index
    %c0_11 = arith.constant 0 : index
    %11 = vector.load %arg6[%c0_10, %c0_11] : memref<1x128xf32, #tpu.memory_space<vmem>>, vector<1x128xf32>
    %12 = vector.broadcast %11 : vector<1x128xf32> to vector<2x128xf32>
    %13 = arith.addf %10, %12 : vector<2x128xf32>
    %14 = arith.mulf %13, %13 : vector<2x128xf32>
    %cst_12 = arith.constant dense<0.000000e+00> : vector<2xf32>
    %15 = vector.multi_reduction <add>, %14, %cst_12 [1] : vector<2x128xf32> to vector<2xf32>
    %16 = vector.shape_cast %15 : vector<2xf32> to vector<2x1xf32>
    %17 = math.sqrt %16 : vector<2x1xf32>
    %cst_13 = arith.constant 9.99999997E-7 : f32
    %18 = vector.broadcast %cst_13 : f32 to vector<2x1xf32>
    %19 = arith.maximumf %17, %18 : vector<2x1xf32>
    %20 = arith.mulf %6, %6 : vector<2x128xf32>
    %cst_14 = arith.constant dense<0.000000e+00> : vector<2xf32>
    %21 = vector.multi_reduction <add>, %20, %cst_14 [1] : vector<2x128xf32> to vector<2xf32>
    %22 = vector.shape_cast %21 : vector<2xf32> to vector<2x1xf32>
    %23 = math.sqrt %22 : vector<2x1xf32>
    %cst_15 = arith.constant 9.99999997E-7 : f32
    %24 = vector.broadcast %cst_15 : f32 to vector<2x1xf32>
    %25 = arith.maximumf %23, %24 : vector<2x1xf32>
    %26 = arith.mulf %7, %7 : vector<2x128xf32>
    %cst_16 = arith.constant dense<0.000000e+00> : vector<2xf32>
    %27 = vector.multi_reduction <add>, %26, %cst_16 [1] : vector<2x128xf32> to vector<2xf32>
    %28 = vector.shape_cast %27 : vector<2xf32> to vector<2x1xf32>
    %29 = math.sqrt %28 : vector<2x1xf32>
    %cst_17 = arith.constant 9.99999997E-7 : f32
    %30 = vector.broadcast %cst_17 : f32 to vector<2x1xf32>
    %31 = arith.maximumf %29, %30 : vector<2x1xf32>
    %32 = arith.mulf %6, %13 : vector<2x128xf32>
    %cst_18 = arith.constant dense<0.000000e+00> : vector<2xf32>
    %33 = vector.multi_reduction <add>, %32, %cst_18 [1] : vector<2x128xf32> to vector<2xf32>
    %34 = vector.shape_cast %33 : vector<2xf32> to vector<2x1xf32>
    %35 = arith.mulf %7, %13 : vector<2x128xf32>
    %cst_19 = arith.constant dense<0.000000e+00> : vector<2xf32>
    %36 = vector.multi_reduction <add>, %35, %cst_19 [1] : vector<2x128xf32> to vector<2xf32>
    %37 = vector.shape_cast %36 : vector<2xf32> to vector<2x1xf32>
    %38 = arith.mulf %25, %19 : vector<2x1xf32>
    %39 = tpu.reciprocal %38 {approx = true} : vector<2x1xf32> -> vector<2x1xf32>
    %40 = arith.mulf %34, %39 : vector<2x1xf32>
    %cst_20 = arith.constant 1.000000e+00 : f32
    %41 = vector.broadcast %cst_20 : f32 to vector<2x1xf32>
    %42 = arith.addf %40, %41 : vector<2x1xf32>
    %cst_21 = arith.constant 5.000000e-01 : f32
    %43 = vector.broadcast %cst_21 : f32 to vector<2x1xf32>
    %44 = arith.mulf %42, %43 : vector<2x1xf32>
    %45 = arith.mulf %31, %19 : vector<2x1xf32>
    %46 = arith.divf %37, %45 : vector<2x1xf32>
    %cst_22 = arith.constant 1.000000e+02 : f32
    %47 = vector.broadcast %cst_22 : f32 to vector<2x1xf32>
    %48 = arith.mulf %46, %47 : vector<2x1xf32>
    %49 = arith.negf %48 : vector<2x1xf32>
    %50 = math.exp %49 : vector<2x1xf32>
    %cst_23 = arith.constant 1.000000e+00 : f32
    %51 = vector.broadcast %cst_23 : f32 to vector<2x1xf32>
    %52 = arith.addf %51, %50 : vector<2x1xf32>
    %53 = arith.divf %51, %52 : vector<2x1xf32>
    %c0_24 = arith.constant 0 : index
    %c0_25 = arith.constant 0 : index
    %54 = vector.load %arg7[%c0_24, %c0_25] : memref<128x128xf32, #tpu.memory_space<vmem>>, vector<128x128xf32>
    %cst_26 = arith.constant dense<0.000000e+00> : vector<2x128xf32>
    %55 = tpu.matmul %6, %54, %cst_26 {dimension_numbers = #tpu.dot_dimension_numbers<[1], [0], [0], [1], [0, 0, 1, 1], [], []>} : vector<2x128xf32>, vector<128x128xf32>, vector<2x128xf32> -> vector<2x128xf32>
    %c0_27 = arith.constant 0 : index
    %c0_28 = arith.constant 0 : index
    %56 = vector.load %arg8[%c0_27, %c0_28] : memref<1x128xf32, #tpu.memory_space<vmem>>, vector<1x128xf32>
    %57 = vector.broadcast %56 : vector<1x128xf32> to vector<2x128xf32>
    %58 = arith.addf %55, %57 : vector<2x128xf32>
    %c0_29 = arith.constant 0 : index
    %c0_30 = arith.constant 0 : index
    %59 = vector.load %arg2[%c0_29, %c0_30] : memref<8x32xf32, #tpu.memory_space<vmem>>, vector<8x32xf32>
    %c0_31 = arith.constant 0 : index
    %c0_32 = arith.constant 0 : index
    %60 = vector.load %arg9[%c0_31, %c0_32] : memref<32x128xf32, #tpu.memory_space<vmem>>, vector<32x128xf32>
    %cst_33 = arith.constant dense<0.000000e+00> : vector<8x128xf32>
    %61 = tpu.matmul %59, %60, %cst_33 {dimension_numbers = #tpu.dot_dimension_numbers<[1], [0], [0], [1], [0, 0, 1, 1], [], []>} : vector<8x32xf32>, vector<32x128xf32>, vector<8x128xf32> -> vector<8x128xf32>
    %c0_34 = arith.constant 0 : index
    %c0_35 = arith.constant 0 : index
    %62 = vector.load %arg10[%c0_34, %c0_35] : memref<1x128xf32, #tpu.memory_space<vmem>>, vector<1x128xf32>
    %63 = vector.broadcast %62 : vector<1x128xf32> to vector<8x128xf32>
    %64 = arith.addf %61, %63 : vector<8x128xf32>
    %c0_36 = arith.constant 0 : index
    %c0_37 = arith.constant 0 : index
    %65 = vector.load %arg11[%c0_36, %c0_37] : memref<16x128xf32, #tpu.memory_space<vmem>>, vector<2x128xf32>
    tpu.vector_store %arg11[%c0_36, %c0_37], %58 {strides = array<i32>} : memref<16x128xf32, #tpu.memory_space<vmem>>, vector<2x128xf32>,
    %c2 = arith.constant 2 : index
    %c0_38 = arith.constant 0 : index
    %66 = vector.load %arg11[%c2, %c0_38] : memref<16x128xf32, #tpu.memory_space<vmem>>, vector<8x128xf32>
    tpu.vector_store %arg11[%c2, %c0_38], %64 {strides = array<i32>} : memref<16x128xf32, #tpu.memory_space<vmem>>, vector<8x128xf32>,
    %67 = tpu.concatenate %44, %53 in 1 : vector<2x1xf32>, vector<2x1xf32> -> vector<2x2xf32>
    %c0_39 = arith.constant 0 : index
    %c0_40 = arith.constant 0 : index
    %68 = vector.load %arg11[%c0_39, %c0_40] : memref<16x128xf32, #tpu.memory_space<vmem>>, vector<2x2xf32>
    tpu.vector_store %arg11[%c0_39, %c0_40], %67 {strides = array<i32>} : memref<16x128xf32, #tpu.memory_space<vmem>>, vector<2x2xf32>,
    %cst_41 = arith.constant 0.000000e+00 : f32
    %69 = vector.broadcast %cst_41 : f32 to vector<6x128xf32>
    %c10 = arith.constant 10 : index
    %c0_42 = arith.constant 0 : index
    %70 = vector.load %arg11[%c10, %c0_42] : memref<16x128xf32, #tpu.memory_space<vmem>>, vector<6x128xf32>
    tpu.vector_store %arg11[%c10, %c0_42], %69 {strides = array<i32>} : memref<16x128xf32, #tpu.memory_space<vmem>>, vector<6x128xf32>,
    return
  }
}

</mosaic_0001>

<bundles_post_ra>
// kernel: base_model_forward.1
= control target key start
LH: loop header
LB: loop body
LE: loop exit
PB: predicated region body
PF: predicated region fallthrough
CT: control target
= control target key end

     0   :  { %v611_v0 = vmov 0.0   ;;  %vm612_vm0 = vmmov 0   ;;  %vm50_vm1 = vcmask 261120   ;;  %vm140_vm2 = vcmask 523264   ;;  %s613_s28 = smov 1   ;;  %s846_s3 = inlined_call_operand.vmem [shape: f32[32,128], index: 3, kind: input, shape index: {}]   ;;  %s847_s7 = inlined_call_operand.vmem [shape: f32[128,128], index: 7, kind: input, shape index: {}]   ;;  %s848_s0 = inlined_call_operand.vmem [shape: f32[4,32], index: 0, kind: input, shape index: {}]   ;;  %s849_s5 = inlined_call_operand.vmem [shape: f32[64,128], index: 5, kind: input, shape index: {}]   ;;  %s850_s1 = inlined_call_operand.vmem [shape: f32[2,64], index: 1, kind: input, shape index: {}]   ;;  %s851_s9 = inlined_call_operand.vmem [shape: f32[32,128], index: 9, kind: input, shape index: {}]   ;;  %s852_s2 = inlined_call_operand.vmem [shape: f32[8,32], index: 2, kind: input, shape index: {}]   ;;  %s853_s4 = inlined_call_operand.vmem [shape: f32[1,128], index: 4, kind: input, shape index: {}]   ;;  %s854_s6 = inlined_call_operand.vmem [shape: f32[1,128], index: 6, kind: input, shape index: {}]   ;;  %s855_s11 = inlined_call_operand.vmem [shape: f32[16,128], index: 11, kind: output, shape index: {}]   ;;  %s856_s10 = inlined_call_operand.vmem [shape: f32[1,128], index: 10, kind: input, shape index: {}]   ;;  %s857_s8 = inlined_call_operand.vmem [shape: f32[1,128], index: 8, kind: input, shape index: {}]  }
   0x1   :  { %518 = vmatprep.subr.mxu1 %v611_v0  ;;  %v42_v1 = vld [vmem:[%s846_s3 + $0x18] sm:$0xff]  ;;  %v41_v2 = vld [vmem:[%s846_s3 + $0x10] sm:$0xff]  ;;  %526 = vmatprep.mubr.msk.f32.mxu1 %vm612_vm0, %v611_v0  ;;  %v40_v3 = vld [vmem:[%s846_s3 + $0x8] sm:$0xff]  ;;  %vm215_vm3 = vcmask 1041408   ;;  %vm239_vm4 = vcmask 1043458   ;;  %vm465_vm11 = vcmask 7168  }
   0x2   :  { %519 = vmatpush3.msra.mxu1 %v42_v1  ;;  %548 = vmatprep.subr.mxu0 %v611_v0  ;;  %v39_v4 = vld [vmem:[%s846_s3] sm:$0xff]  ;;  %v295_v5 = vld [vmem:[%s847_s7 + $0x78] sm:$0xff]  ;;  %v294_v7 = vld [vmem:[%s847_s7 + $0x70] sm:$0xff]  ;;  %469 = vst [vmem:[%s855_s11 + $0xa] sm:$0x3f] %v611_v0  ;;  %vm467_vm12 = vcmask 9216  }
   0x3   :  { %520 = vmatprep.subr.mxu1 %v611_v0  ;;  %580 = vmatprep.mubr.msk.f32.mxu0 %vm612_vm0, %v611_v0  ;;  %v38_v6 = vld [vmem:[%s848_s0] sm:$0xf]  ;;  %v132_v8 = vld [vmem:[%s849_s5 + $0x38] sm:$0xff]  ;;  %v131_v9 = vld [vmem:[%s849_s5 + $0x30] sm:$0xff] }
   0x4   :  { %521 = vmatpush3.msra.mxu1 %v41_v2  ;;  %549 = vmatpush3.msra.mxu0 %v295_v5  ;;  %v293_v10 = vld [vmem:[%s847_s7 + $0x68] sm:$0xff]  ;;  %v292_v12 = vld [vmem:[%s847_s7 + $0x60] sm:$0xff]  ;;  %v291_v14 = vld [vmem:[%s847_s7 + $0x58] sm:$0xff] }
   0x5   :  { %522 = vmatprep.subr.mxu1 %v611_v0  ;;  %550 = vmatprep.subr.mxu0 %v611_v0  ;;  %v130_v11 = vld [vmem:[%s849_s5 + $0x28] sm:$0xff]  ;;  %v129_v13 = vld [vmem:[%s849_s5 + $0x20] sm:$0xff]  ;;  %v128_v15 = vld [vmem:[%s849_s5 + $0x18] sm:$0xff] }
   0x6   :  { %523 = vmatpush3.msra.mxu1 %v40_v3  ;;  %551 = vmatpush3.msra.mxu0 %v294_v7  ;;  %v290_v16 = vld [vmem:[%s847_s7 + $0x50] sm:$0xff]  ;;  %v289_v18 = vld [vmem:[%s847_s7 + $0x48] sm:$0xff]  ;;  %v288_v20 = vld [vmem:[%s847_s7 + $0x40] sm:$0xff] }
   0x7   :  { %524 = vmatprep.subr.mxu1 %v611_v0  ;;  %552 = vmatprep.subr.mxu0 %v611_v0  ;;  %v127_v17 = vld [vmem:[%s849_s5 + $0x10] sm:$0xff]  ;;  %v126_v19 = vld [vmem:[%s849_s5 + $0x8] sm:$0xff]  ;;  %v125_v21 = vld [vmem:[%s849_s5] sm:$0xff] }
   0x8   :  { %525 = vmatpush3.msra.mxu1 %v39_v4  ;;  %553 = vmatpush3.msra.mxu0 %v293_v10  ;;  %v287_v22 = vld [vmem:[%s847_s7 + $0x38] sm:$0xff]  ;;  %v124_v23 = vld [vmem:[%s850_s1] sm:$0x3]  ;;  %v286_v24 = vld [vmem:[%s847_s7 + $0x30] sm:$0xff] }
   0x9   :  { %527 = vmatmul.mubr.msk.f32.vlgmr.msra.gmra.mxu1 %vm50_vm1, %v38_v6  ;;  %529 = vmatprep.subr.mxu1 %v611_v0  ;;  %v285_v25 = vld [vmem:[%s847_s7 + $0x28] sm:$0xff]  ;;  %v284_v26 = vld [vmem:[%s847_s7 + $0x20] sm:$0xff]  ;;  %v283_v27 = vld [vmem:[%s847_s7 + $0x18] sm:$0xff] }
   0xa   :  { %530 = vmatpush3.msra.mxu1 %v132_v8  ;;  %545 = vmatprep.mubr.msk.f32.mxu1 %vm612_vm0, %v611_v0  ;;  %v282_v28 = vld [vmem:[%s847_s7 + $0x10] sm:$0xff]  ;;  %v281_v29 = vld [vmem:[%s847_s7 + $0x8] sm:$0xff]  ;;  %v280_v30 = vld [vmem:[%s847_s7] sm:$0xff] }
   0xb   :  { %531 = vmatprep.subr.mxu1 %v611_v0  ;;  %554 = vmatprep.subr.mxu0 %v611_v0  ;;  %v377_v31 = vld [vmem:[%s851_s9 + $0x18] sm:$0xff]  ;;  %v376_v32 = vld [vmem:[%s851_s9 + $0x10] sm:$0xff]  ;;  %v375_v33 = vld [vmem:[%s851_s9 + $0x8] sm:$0xff] }
   0xc   :  { %532 = vmatpush3.msra.mxu1 %v131_v9  ;;  %555 = vmatpush3.msra.mxu0 %v292_v12  ;;  %v374_v34 = vld [vmem:[%s851_s9] sm:$0xff] }
   0xd   :  { %533 = vmatprep.subr.mxu1 %v611_v0  ;;  %556 = vmatprep.subr.mxu0 %v611_v0  ;;  %v373_v35 = vld [vmem:[%s852_s2] sm:$0xff] }
   0xe   :  { %534 = vmatpush3.msra.mxu1 %v130_v11  ;;  %557 = vmatpush3.msra.mxu0 %v291_v14  ;;  %v474_v36 = vld [vmem:[%s853_s4] ss:$0 sm:$0xff] }
   0xf   :  { %535 = vmatprep.subr.mxu1 %v611_v0  ;;  %558 = vmatprep.subr.mxu0 %v611_v0  ;;  %v476_v40 = vld [vmem:[%s854_s6] ss:$0 sm:$0xff] }
  0x10   :  { %536 = vmatpush3.msra.mxu1 %v129_v13  ;;  %559 = vmatpush3.msra.mxu0 %v290_v16  ;;  %v480_v55 = vld [vmem:[%s856_s10] ss:$0 sm:$0xff] }
  0x11   :  { %537 = vmatprep.subr.mxu1 %v611_v0  ;;  %560 = vmatprep.subr.mxu0 %v611_v0  ;;  %v479_v10 = vld [vmem:[%s857_s8] ss:$0 sm:$0xff] }
  0x12   :  { %538 = vmatpush3.msra.mxu1 %v128_v15  ;;  %561 = vmatpush3.msra.mxu0 %v289_v18 }
  0x13   :  { %539 = vmatprep.subr.mxu1 %v611_v0  ;;  %562 = vmatprep.subr.mxu0 %v611_v0 }
  0x14   :  { %540 = vmatpush3.msra.mxu1 %v127_v17  ;;  %563 = vmatpush3.msra.mxu0 %v288_v20 }
  0x15   :  { %541 = vmatprep.subr.mxu1 %v611_v0  ;;  %564 = vmatprep.subr.mxu0 %v611_v0 }
  0x16   :  { %542 = vmatpush3.msra.mxu1 %v126_v19  ;;  %565 = vmatpush3.msra.mxu0 %v287_v22 }
  0x17   :  { %543 = vmatprep.subr.mxu1 %v611_v0  ;;  %566 = vmatprep.subr.mxu0 %v611_v0 }
  0x18   :  { %544 = vmatpush3.msra.mxu1 %v125_v21  ;;  %567 = vmatpush3.msra.mxu0 %v286_v24 }
  0x19   :  { %546 = vmatmul.mubr.msk.f32.vlgmr.msra.gmra.mxu1 %vm140_vm2, %v124_v23  ;;  %583 = vmatprep.subr.mxu1 %v611_v0 }
  0x1a   :  { %568 = vmatprep.subr.mxu0 %v611_v0  ;;  %591 = vmatprep.mubr.msk.f32.mxu1 %vm612_vm0, %v611_v0 }
  0x1b   :  { %569 = vmatpush3.msra.mxu0 %v285_v25  ;;  %584 = vmatpush3.msra.mxu1 %v377_v31 }
  0x1c   :  { %570 = vmatprep.subr.mxu0 %v611_v0  ;;  %585 = vmatprep.subr.mxu1 %v611_v0 }
  0x1d   :  { %571 = vmatpush3.msra.mxu0 %v284_v26  ;;  %586 = vmatpush3.msra.mxu1 %v376_v32 }
  0x1e   :  { %572 = vmatprep.subr.mxu0 %v611_v0  ;;  %587 = vmatprep.subr.mxu1 %v611_v0 }
  0x1f   :  { %573 = vmatpush3.msra.mxu0 %v283_v27  ;;  %588 = vmatpush3.msra.mxu1 %v375_v33 }
  0x20   :  { %574 = vmatprep.subr.mxu0 %v611_v0  ;;  %589 = vmatprep.subr.mxu1 %v611_v0 }
  0x21   :  { %575 = vmatpush3.msra.mxu0 %v282_v28  ;;  %590 = vmatpush3.msra.mxu1 %v374_v34 }
  0x22   :  { %576 = vmatprep.subr.mxu0 %v611_v0  ;;  %592 = vmatmul.mubr.msk.f32.vlgmr.msra.gmra.mxu1 %vm50_vm1, %v373_v35 }
  0x23   :  { %577 = vmatpush3.msra.mxu0 %v281_v29 }
  0x24   :  { %578 = vmatprep.subr.mxu0 %v611_v0 }
  0x25   :  { %579 = vmatpush3.msra.mxu0 %v280_v30 }
  0xc9   :  { %v120_v37 = vpop.f32.mrf.mxu1 }
  0xca   :  { %v121_v38 = vadd.f32 %v474_v36, %v120_v37 }
  0xcb   :  { %v528_v39 = vpop.f32.mrf.mxu1 }
  0xcc   :  { %581 = vmatmul.mubr.f32.vlgmr.msra.gmra.mxu0 %v121_v38  ;;  %v227_v48 = vmul.f32 %v121_v38, %v121_v38 }
  0xce   :  { %v240_v50 = vsel %vm239_vm4, %v227_v48, 0.0  ;;  %v228_v52 = vsel %vm215_vm3, %v227_v48, 0.0 }
  0xd9   :  { %v210_v41 = vpop.f32.mrf.mxu1 }
  0xda   :  { %v211_v42 = vadd.f32 %v476_v40, %v210_v41 }
  0xdb   :  { %v547_v43 = vpop.f32.mrf.mxu1 }
  0xdc   :  { %v214_v44 = vmul.f32 %v211_v42, %v211_v42  ;;  %v256_v45 = vrot.slane %v211_v42, 6  ;;  %v251_v51 = vmul.f32 %v211_v42, %v121_v38 }
  0xde   :  { %v216_v46 = vsel %vm215_vm3, %v214_v44, 0.0  ;;  %v258_v47 = vmul.f32 %v256_v45, %v121_v38  ;;  %v252_v53 = vsel %vm215_vm3, %v251_v51, 0.0 }
  0xdf   :  { %217 = vadd.xlane.f32.xlu0 %v216_v46 }
  0xe0   :  { %v259_v49 = vsel %vm239_vm4, %v258_v47, 0.0 }
  0xe1   :  { %260 = vadd.xlane.f32.xlu1 %v259_v49 }
  0xe2   :  { %v454_v54 = vpop.f32.mrf.mxu1 }
  0xe3   :  { %241 = vadd.xlane.f32.xlu0 %v240_v50  ;;  %v455_v56 = vadd.f32 %v480_v55, %v454_v54 }
  0xe4   :  { %v593_v57 = vpop.f32.mrf.mxu1 }
  0xe5   :  { %229 = vadd.xlane.f32.xlu1 %v228_v52  ;;  %459 = vst [vmem:[%s855_s11 + $0x2] sm:$0xff] %v455_v56 }
  0xe7   :  { %253 = vadd.xlane.f32.xlu0 %v252_v53 }
 0x168   :  { %v218_v58 = vpop.xlane.xlu0 %217 }
 0x169   :  { %597 = vrsqrt.f32 %v218_v58  ;;  %vm221_vm5 = vcmp.eq.f32.partialorder %v218_v58, inf  ;;  %v224_v62 = vand.u32 2147483648, %v218_v58  ;;  %vm223_vm6 = vcmp.eq.f32.partialorder %v218_v58, 0.0 }
 0x16a   :  { %v261_v15 = vpop.xlane.xlu1 %260 }
 0x16c   :  { %v242_v59 = vpop.xlane.xlu0 %241 }
 0x16d   :  { %599 = vrsqrt.f32 %v242_v59  ;;  %vm245_vm7 = vcmp.eq.f32.partialorder %v242_v59, inf  ;;  %v248_v4 = vand.u32 2147483648, %v242_v59  ;;  %vm247_vm8 = vcmp.eq.f32.partialorder %v242_v59, 0.0 }
 0x16e   :  { %v230_v23 = vpop.xlane.xlu1 %229 }
 0x16f   :  { %vm233_vm9 = vcmp.eq.f32.partialorder %v230_v23, inf  ;;  %v236_v27 = vand.u32 2147483648, %v230_v23  ;;  %vm235_vm10 = vcmp.eq.f32.partialorder %v230_v23, 0.0 }
 0x170   :  { %v254_v32 = vpop.xlane.xlu0 %253 }
 0x176   :  { %v598_v60 = vpop.eup %597 }
 0x177   :  { %v220_v61 = vmul.f32 %v598_v60, %v218_v58 }
 0x179   :  { %v222_v63 = vsel %vm221_vm5, %v218_v58, %v220_v61 }
 0x17a   :  { %v600_v0 = vpop.eup %599  ;;  %v225_v1 = vsel %vm223_vm6, %v224_v62, %v222_v63 }
 0x17b   :  { %v226_v2 = vmax.f32 %v225_v1, 1e-06  ;;  %v244_v3 = vmul.f32 %v600_v0, %v242_v59 }
 0x17d   :  { %v246_v5 = vsel %vm245_vm7, %v242_v59, %v244_v3  ;;  %v268_v7 = vrot.slane %v226_v2, 6 }
 0x17e   :  { %v249_v6 = vsel %vm247_vm8, %v248_v4, %v246_v5 }
 0x17f   :  { %v250_v8 = vmax.f32 %v249_v6, 1e-06 }
 0x181   :  { %v270_v9 = vmul.f32 %v268_v7, %v250_v8 }
 0x183   :  { %601 = vrcp.f32 %v270_v9 }
 0x18c   :  { %v369_v11 = vpop.f32.mrf.mxu0 }
 0x18d   :  { %v370_v12 = vadd.f32 %v479_v10, %v369_v11 }
 0x18e   :  { %v582_v13 = vpop.f32.mrf.mxu0 }
 0x18f   :  { %458 = vst [vmem:[%s855_s11] sm:$0x3] %v370_v12 }
 0x190   :  { %v602_v14 = vpop.eup %601 }
 0x191   :  { %v272_v16 = vmul.f32 %v602_v14, %v261_v15 }
 0x193   :  { %v478_v17 = vmul.f32 -100.0, %v272_v16 }
 0x195   :  { %v275_v18 = vmul.f32 1.442695, %v478_v17 }
 0x197   :  { %603 = vpow2.f32 %v275_v18 }
 0x1a4   :  { %v604_v19 = vpop.eup %603 }
 0x1a5   :  { %v277_v20 = vadd.f32 1.0, %v604_v19 }
 0x1a7   :  { %605 = vrcp.f32 %v277_v20 }
 0x1a8   :  { %607 = vrsqrt.f32 %v230_v23 }
 0x1b4   :  { %v606_v21 = vpop.eup %605 }
 0x1b5   :  { %v461_v22 = vrot.slane %v606_v21, 2  ;;  %v608_v24 = vpop.eup %607 }
 0x1b6   :  { %v232_v25 = vmul.f32 %v608_v24, %v230_v23 }
 0x1b7   :  { %462 = vrot.lane.b32.xlu1 %v461_v22, %s613_s28 }
 0x1b8   :  { %v234_v26 = vsel %vm233_vm9, %v230_v23, %v232_v25 }
 0x1b9   :  { %v237_v28 = vsel %vm235_vm10, %v236_v27, %v234_v26 }
 0x1ba   :  { %v238_v29 = vmax.f32 %v237_v28, 1e-06 }
 0x1bc   :  { %v262_v30 = vmul.f32 %v238_v29, %v226_v2 }
 0x1be   :  { %609 = vrcp.f32 %v262_v30 }
 0x1cb   :  { %v610_v31 = vpop.eup %609 }
 0x1cc   :  { %v264_v33 = vmul.f32 %v610_v31, %v254_v32 }
 0x1ce   :  { %v265_v34 = vadd.f32 1.0, %v264_v33 }
 0x1d0   :  { %v266_v35 = vmul.f32 0.5, %v265_v34 }
 0x229   :  { %v463_v36 = vpop.permute.xlu1 %462 }
 0x22a   :  { %v466_v37 = vsel %vm465_vm11, %v266_v35, %v463_v36 }
 0x22b   :  { %468 = vst.msk [vmem:[%s855_s11] sm:$0x3] %vm467_vm12, %v466_v37 }

</bundles_post_ra>
